<compile_context>
chip_gen: v7x
topology: tpu7x:2x2x1
jax: 0.10.0
libtpu: 0.0.40
codegen_flags: <defaults>
</compile_context>

<pallas_src>
import jax
import jax.numpy as jnp
import numpy as np
from jax.experimental import pallas as pl
from jax.experimental.pallas import tpu as pltpu


def _pixel_kernel(logits_ref, label_ref, key_ref, ce_ref, fgc_ref):
    """Per-pixel hot path: CE partials, fg-count partials, packed negated lovasz key."""
    logits = logits_ref[...].astype(jnp.float32)              # (C, tn), upcast in VMEM
    label = label_ref[...]                                     # (1, tn) int32
    C, tn = logits.shape

    cls_ids = jax.lax.broadcasted_iota(jnp.int32, (C, tn), 0)
    fg_b = cls_ids == label                                    # one-hot bool (C, tn)
    fg = fg_b.astype(jnp.float32)
    valid = label != 0                                         # ignore label == 0

    # CrossEntropyLoss on raw logits: -log_softmax(logits)[label]  (per pixel)
    lmax = jnp.max(logits, axis=0, keepdims=True)
    z = logits - lmax
    ez = jnp.exp(z)
    sez = jnp.sum(ez, axis=0, keepdims=True)
    ce_pix = jnp.log(sez) - jnp.sum(jnp.where(fg_b, z, 0.0), axis=0, keepdims=True)
    # per-block CE partial (scalar), pre-divided by 128 (exact: power of two) and
    # broadcast lane-dense so the (1,128) store is unmasked.
    ce_ref[...] = jnp.full((1, 128), jnp.sum(ce_pix) * (1.0 / 128.0), dtype=jnp.float32)

    # per-class foreground counts over *valid* pixels (lovasz gts / classes='present')
    fgc = jnp.sum(jnp.where(valid, fg, 0.0), axis=-1, keepdims=True) * (1.0 / 128.0)
    fgc_ref[...] = jnp.broadcast_to(fgc, (C, 128))

    # softmax via EUP reciprocal + one Newton step (keeps it ~exact for the tolerance)
    inv = pl.reciprocal(sez, approx=True)
    inv = inv * (2.0 - sez * inv)
    probs = ez * inv

    # Lovasz error |fg - softmax| packed with the fg bit in the mantissa LSB of
    # (err + 2.0) (1-ulp perturbation).  Emitted already NEGATED so the wrapper can
    # use a single ascending sort with no extra negation passes.
    errs = jnp.abs(fg - probs)
    bits = pltpu.bitcast(errs + 2.0, jnp.int32)
    packed = (bits & jnp.int32(-2)) | fg_b.astype(jnp.int32)
    key = pltpu.bitcast(packed, jnp.float32)                   # in [2, 3]
    key_ref[...] = jnp.where(valid, -key, 1.0)                 # ignored sort to the back


def _lovasz_kernel(tri_ref, key_ref, gts_ref, out_ref, cum_ref, loss_ref):
    """Blocked Lovasz-softmax reduction on per-class ascending-sorted negated keys."""
    step = pl.program_id(0)
    C, tile = key_ref.shape
    ts = tri_ref.shape[0]
    n_sub = tile // ts

    @pl.when(step == 0)
    def _init():
        cum_ref[...] = jnp.zeros_like(cum_ref)
        loss_ref[...] = jnp.zeros_like(loss_ref)

    gts = gts_ref[...]                                         # (C, 1)
    tri = tri_ref[...]                                         # (ts, ts) bf16, resident
    col = jax.lax.broadcasted_iota(jnp.int32, (C, ts), 1)

    carry = cum_ref[...]                                       # running cumsum(fg)
    loss_acc = jnp.zeros((C, 1), jnp.float32)
    # DMA tile (tile) decoupled from cumsum matmul tile (ts): n_sub small sub-matmuls.
    for j in range(n_sub):
        # unpack: fg bit in the LSB; err = |value| with LSB cleared, minus 2
        bits = pltpu.bitcast(key_ref[:, pl.ds(j * ts, ts)], jnp.int32)
        fg = (bits & 1).astype(jnp.float32)                    # (C, ts)
        mag = pltpu.bitcast(bits & jnp.int32(0x7FFFFFFE), jnp.float32)
        err = jnp.maximum(mag - 2.0, 0.0)                      # ignored (+1.0) -> 0

        # global inclusive cumsum of fg = carry + intra-sub-tile upper-tri matmul
        cum_fg = carry + jnp.dot(fg.astype(jnp.bfloat16), tri,
                                 preferred_element_type=jnp.float32)

        gpos = step * tile + j * ts + col                      # global sorted position
        is_first = gpos == 0
        kpos = gpos.astype(jnp.float32)

        union = gts + (kpos + 1.0) - cum_fg
        jac = 1.0 - (gts - cum_fg) / union
        prev_cum = cum_fg - fg
        prev_union = jnp.where(is_first, 1.0, gts + kpos - prev_cum)   # guard 0/0
        prev_jac = 1.0 - (gts - prev_cum) / prev_union
        grad = jnp.where(is_first, jac, jac - prev_jac)                # lovasz_grad

        loss_acc = loss_acc + jnp.sum(err * grad, axis=-1, keepdims=True)
        carry = carry + jnp.sum(fg, axis=-1, keepdims=True)

    loss_ref[...] = loss_ref[...] + loss_acc
    cum_ref[...] = carry

    @pl.when(step == pl.num_programs(0) - 1)
    def _finalize():
        present = (gts > 0.0).astype(jnp.float32)              # classes='present'
        n_present = jnp.sum(present)
        total = jnp.sum(loss_ref[...] * present)
        res = jnp.where(n_present > 0.0, total / jnp.maximum(n_present, 1.0), 0.0)
        out_ref[...] = jnp.broadcast_to(res, (1, 1))


def simple_loss(ypred, ytgt, pos_weight=2.13, tile_px=8192, tile_ls=2048):
    """Forward of SimpleLoss: CE(ypred, argmax(ytgt)) + LovaszSoftmax(softmax(ypred), ignore=0)."""
    del pos_weight  # BCEWithLogitsLoss is never invoked in the reference forward()
    B, C, H, W = ypred.shape
    HW = H * W
    N = B * HW
    assert HW % 128 == 0, "demo assumes H*W is a multiple of 128"

    # Stage 0: (1, N) int32 label plane once in XLA; kernel never sees the one-hot target.
    label = jnp.argmax(ytgt, axis=1).astype(jnp.int32).reshape(B, 1, HW)
    logits = ypred.reshape(B, C, HW)          # free reshape; dtype upcast happens in-kernel

    # VMEM-aware tile: 2x-buffered logits + key out + label + ~4 live f32 temporaries.
    # 10 MiB fits the default scoped limits on v5e (16 MiB), v6e (32) and v7x (32 of 64).
    bytes_per_px = C * (2 * ypred.dtype.itemsize + 2 * 4 + 4 * 4) + 2 * 4
    vmem_budget = 10 * 1024 * 1024
    tile_px = min(tile_px, max(128, (vmem_budget // bytes_per_px) // 128 * 128), HW)
    while HW % tile_px:
        tile_px -= 128
    tiles_per_img = HW // tile_px
    n_blocks = B * tiles_per_img

    key, ce_part, fg_part = pl.pallas_call(
        _pixel_kernel,
        out_shape=(
            jax.ShapeDtypeStruct((C, N), jnp.float32),               # negated packed key
            jax.ShapeDtypeStruct((1, n_blocks * 128), jnp.float32),  # per-block CE/128
            jax.ShapeDtypeStruct((C, n_blocks * 128), jnp.float32),  # per-block fg/128
        ),
        grid=(B, tiles_per_img),
        in_specs=[
            pl.BlockSpec((None, C, tile_px), lambda b, i: (b, 0, i)),
            pl.BlockSpec((None, 1, tile_px), lambda b, i: (b, 0, i)),
        ],
        out_specs=(
            pl.BlockSpec((C, tile_px), lambda b, i: (0, b * tiles_per_img + i)),
            pl.BlockSpec((1, 128), lambda b, i: (0, b * tiles_per_img + i)),
            pl.BlockSpec((C, 128), lambda b, i: (0, b * tiles_per_img + i)),
        ),
        compiler_params=pltpu.CompilerParams(
            dimension_semantics=("parallel", "parallel"),
            vmem_limit_bytes=32 * 1024 * 1024),
    )(logits, label)

    # CrossEntropyLoss reduction='mean' over ALL pixels (no ignore_index).
    loss_wce = jnp.sum(ce_part) / N
    # per-class foreground totals over valid pixels (class 0 is always 0 -> not present)
    gts = jnp.sum(fg_part, axis=-1, keepdims=True)                   # (C, 1)

    # TODO(synk): no Pallas TPU sort primitive; the per-class sort stays in XLA.
    # Keys come out pre-negated, so ONE ascending sort and no negation passes.
    key_sorted = jnp.sort(key, axis=-1)

    tile_ls = min(tile_ls, N)
    while N % tile_ls:
        tile_ls -= 128
    ts = 256 if tile_ls % 256 == 0 else 128
    # small constant upper-tri built once in XLA, resident via constant index_map
    tri = (jnp.arange(ts)[:, None] <= jnp.arange(ts)[None, :]).astype(jnp.bfloat16)

    # TODO(synk): on v7x the sequential reduction could be split across both
    # TensorCores by class rows, but that only pays off for C >= 16.
    loss_ls = pl.pallas_call(
        _lovasz_kernel,
        out_shape=jax.ShapeDtypeStruct((1, 1), jnp.float32),
        grid=(N // tile_ls,),
        in_specs=[
            pl.BlockSpec((ts, ts), lambda i: (0, 0)),      # constant tri, DMA'd once
            pl.BlockSpec((C, tile_ls), lambda i: (0, i)),
            pl.BlockSpec((C, 1), lambda i: (0, 0)),
        ],
        out_specs=pl.BlockSpec((1, 1), lambda i: (0, 0)),
        scratch_shapes=[
            pltpu.VMEM((C, 1), jnp.float32),               # running cumsum(fg) carry
            pltpu.VMEM((C, 1), jnp.float32),               # per-class loss accumulator
        ],
        compiler_params=pltpu.CompilerParams(dimension_semantics=("arbitrary",)),
    )(tri, key_sorted, gts)[0, 0]

    return loss_wce + loss_ls


def _reference_loss(ypred, ytgt):
    """Pure-numpy (f64) reference of the module's forward pass."""
    yp = np.asarray(ypred, dtype=np.float64)
    yt = np.asarray(ytgt, dtype=np.float64)
    B, C, H, W = yp.shape
    label = yt.argmax(axis=1)                                             # (B, H, W)
    z = yp - yp.max(axis=1, keepdims=True)
    ez = np.exp(z)
    logsum = np.log(ez.sum(axis=1))
    zlab = np.take_along_axis(z, label[:, None], axis=1)[:, 0]
    ce = (logsum - zlab).mean()

    probs = (ez / ez.sum(axis=1, keepdims=True)).transpose(0, 2, 3, 1).reshape(-1, C)
    lab = label.reshape(-1)
    keep = lab != 0                                                       # ignore = 0
    probs, lab = probs[keep], lab[keep]
    losses = []
    for c in range(C):
        fg = (lab == c).astype(np.float64)
        if fg.sum() == 0:
            continue
        errors = np.abs(fg - probs[:, c])
        order = np.argsort(-errors)
        err_s, fg_s = errors[order], fg[order]
        gsum = fg_s.sum()
        inter = gsum - np.cumsum(fg_s)
        union = gsum + np.cumsum(1.0 - fg_s)
        jac = 1.0 - inter / union
        grad = jac.copy()
        if grad.size > 1:
            grad[1:] = jac[1:] - jac[:-1]
        losses.append(float((err_s * grad).sum()))
    ls = float(np.mean(losses)) if losses else 0.0
    return float(ce + ls)


if __name__ == "__main__":
    key = jax.random.PRNGKey(0)
    k1, k2 = jax.random.split(key)
    B, C, H, W = 2, 4, 16, 16
    ypred = jax.random.normal(k1, (B, C, H, W), dtype=jnp.float32)        # logits, NCHW
    labels = jax.random.randint(k2, (B, H, W), 0, C)                      # includes ignore label 0
    ytgt = jax.nn.one_hot(labels, C, axis=1, dtype=jnp.float32)           # NCHW one-hot target

    loss = jax.jit(simple_loss)(ypred, ytgt)
    loss = jax.block_until_ready(loss)
    assert jnp.isfinite(loss), f"non-finite loss: {loss}"

    ref = _reference_loss(ypred, ytgt)
    assert abs(float(loss) - ref) < 2e-3, f"mismatch: kernel={float(loss)} ref={ref}"
    print("KERNEL_OK")
</pallas_src>

<mosaic_0001>
module attributes {stable_mosaic.version = 11 : i64} {
  func.func @_pixel_kernel(%arg0: i32, %arg1: i32, %arg2: memref<1x4x256xf32, #tpu.memory_space<vmem>>, %arg3: memref<1x1x256xi32, #tpu.memory_space<vmem>>, %arg4: memref<4x256xf32, #tpu.memory_space<vmem>>, %arg5: memref<1x128xf32, #tpu.memory_space<vmem>>, %arg6: memref<4x128xf32, #tpu.memory_space<vmem>>) attributes {dimension_semantics = [#tpu.dimension_semantics<parallel>, #tpu.dimension_semantics<parallel>], iteration_bounds = array<i64: 2, 1>, scalar_prefetch = 0 : i64, scratch_operands = 0 : i64, tpu.core_type = #tpu.core_type<tc>, window_params = [{transform_indices = @transform_0, window_bounds = array<i64: 1, 4, 256>}, {transform_indices = @transform_1, window_bounds = array<i64: 1, 1, 256>}, {transform_indices = @transform_2, window_bounds = array<i64: 4, 256>}, {transform_indices = @transform_3, window_bounds = array<i64: 1, 128>}, {transform_indices = @transform_4, window_bounds = array<i64: 4, 128>}]} {
    %c0 = arith.constant 0 : index
    %c0_0 = arith.constant 0 : index
    %c0_1 = arith.constant 0 : index
    %0 = vector.load %arg2[%c0, %c0_0, %c0_1] : memref<1x4x256xf32, #tpu.memory_space<vmem>>, vector<1x4x256xf32>
    %1 = vector.shape_cast %0 : vector<1x4x256xf32> to vector<4x256xf32>
    %c0_2 = arith.constant 0 : index
    %c0_3 = arith.constant 0 : index
    %c0_4 = arith.constant 0 : index
    %2 = vector.load %arg3[%c0_2, %c0_3, %c0_4] : memref<1x1x256xi32, #tpu.memory_space<vmem>>, vector<1x1x256xi32>
    %3 = vector.shape_cast %2 : vector<1x1x256xi32> to vector<1x256xi32>
    %4 = tpu.iota {dimensions = array<i32: 0>} : vector<4x256xi32>
    %5 = vector.broadcast %3 : vector<1x256xi32> to vector<4x256xi32>
    %6 = arith.cmpi eq, %4, %5 : vector<4x256xi32>
    %7 = arith.extui %6 : vector<4x256xi1> to vector<4x256xi32>
    %8 = arith.sitofp %7 : vector<4x256xi32> to vector<4x256xf32>
    %c0_i32 = arith.constant 0 : i32
    %9 = vector.broadcast %c0_i32 : i32 to vector<1x256xi32>
    %10 = arith.cmpi ne, %3, %9 : vector<1x256xi32>
    %cst = arith.constant dense<0xFF800000> : vector<256xf32>
    %11 = vector.multi_reduction <maximumf>, %1, %cst [0] : vector<4x256xf32> to vector<256xf32>
    %12 = vector.shape_cast %11 : vector<256xf32> to vector<1x256xf32>
    %13 = vector.broadcast %12 : vector<1x256xf32> to vector<4x256xf32>
    %14 = arith.subf %1, %13 : vector<4x256xf32>
    %15 = math.exp %14 : vector<4x256xf32>
    %cst_5 = arith.constant dense<0.000000e+00> : vector<256xf32>
    %16 = vector.multi_reduction <add>, %15, %cst_5 [0] : vector<4x256xf32> to vector<256xf32>
    %17 = vector.shape_cast %16 : vector<256xf32> to vector<1x256xf32>
    %18 = math.log %17 : vector<1x256xf32>
    %cst_6 = arith.constant 0.000000e+00 : f32
    %19 = vector.broadcast %cst_6 : f32 to vector<4x256xf32>
    %20 = arith.select %6, %14, %19 : vector<4x256xi1>, vector<4x256xf32>
    %cst_7 = arith.constant dense<0.000000e+00> : vector<256xf32>
    %21 = vector.multi_reduction <add>, %20, %cst_7 [0] : vector<4x256xf32> to vector<256xf32>
    %22 = vector.shape_cast %21 : vector<256xf32> to vector<1x256xf32>
    %23 = arith.subf %18, %22 : vector<1x256xf32>
    %24 = vector.shape_cast %23 : vector<1x256xf32> to vector<1x1x256xf32>
    %cst_8 = arith.constant dense<0.000000e+00> : vector<1xf32>
    %25 = vector.multi_reduction <add>, %24, %cst_8 [1, 2] : vector<1x1x256xf32> to vector<1xf32>
    %26 = vector.shape_cast %25 : vector<1xf32> to vector<1x1x1xf32>
    %27 = vector.extract %26[0, 0, 0] : f32 from vector<1x1x1xf32>
    %cst_9 = arith.constant 7.812500e-03 : f32
    %28 = arith.mulf %27, %cst_9 : f32
    %29 = vector.broadcast %28 : f32 to vector<1x128xf32>
    %c0_10 = arith.constant 0 : index
    %c0_11 = arith.constant 0 : index
    %30 = vector.load %arg5[%c0_10, %c0_11] : memref<1x128xf32, #tpu.memory_space<vmem>>, vector<1x128xf32>
    tpu.vector_store %arg5[%c0_10, %c0_11], %29 {strides = array<i32>} : memref<1x128xf32, #tpu.memory_space<vmem>>, vector<1x128xf32>,
    %cst_12 = arith.constant 0.000000e+00 : f32
    %31 = vector.shape_cast %10 : vector<1x256xi1> to vector<1x256xi1>
    %32 = vector.broadcast %31 : vector<1x256xi1> to vector<4x256xi1>
    %33 = vector.broadcast %cst_12 : f32 to vector<4x256xf32>
    %34 = arith.select %32, %8, %33 : vector<4x256xi1>, vector<4x256xf32>
    %cst_13 = arith.constant dense<0.000000e+00> : vector<4xf32>
    %35 = vector.multi_reduction <add>, %34, %cst_13 [1] : vector<4x256xf32> to vector<4xf32>
    %36 = vector.shape_cast %35 : vector<4xf32> to vector<4x1xf32>
    %cst_14 = arith.constant 7.812500e-03 : f32
    %37 = vector.broadcast %cst_14 : f32 to vector<4x1xf32>
    %38 = arith.mulf %36, %37 : vector<4x1xf32>
    %39 = vector.shape_cast %38 : vector<4x1xf32> to vector<4x1xf32>
    %40 = vector.broadcast %39 : vector<4x1xf32> to vector<4x128xf32>
    %c0_15 = arith.constant 0 : index
    %c0_16 = arith.constant 0 : index
    %41 = vector.load %arg6[%c0_15, %c0_16] : memref<4x128xf32, #tpu.memory_space<vmem>>, vector<4x128xf32>
    tpu.vector_store %arg6[%c0_15, %c0_16], %40 {strides = array<i32>} : memref<4x128xf32, #tpu.memory_space<vmem>>, vector<4x128xf32>,
    %42 = tpu.reciprocal %17 {approx = true} : vector<1x256xf32> -> vector<1x256xf32>
    %43 = arith.mulf %17, %42 : vector<1x256xf32>
    %cst_17 = arith.constant 2.000000e+00 : f32
    %44 = vector.broadcast %cst_17 : f32 to vector<1x256xf32>
    %45 = arith.subf %44, %43 : vector<1x256xf32>
    %46 = arith.mulf %42, %45 : vector<1x256xf32>
    %47 = vector.broadcast %46 : vector<1x256xf32> to vector<4x256xf32>
    %48 = arith.mulf %15, %47 : vector<4x256xf32>
    %49 = arith.subf %8, %48 : vector<4x256xf32>
    %50 = math.absf %49 : vector<4x256xf32>
    %cst_18 = arith.constant 2.000000e+00 : f32
    %51 = vector.broadcast %cst_18 : f32 to vector<4x256xf32>
    %52 = arith.addf %50, %51 : vector<4x256xf32>
    %53 = tpu.bitcast %52 : vector<4x256xf32> -> vector<4x256xi32>
    %c-2_i32 = arith.constant -2 : i32
    %54 = vector.broadcast %c-2_i32 : i32 to vector<4x256xi32>
    %55 = arith.andi %53, %54 : vector<4x256xi32>
    %56 = arith.extui %6 : vector<4x256xi1> to vector<4x256xi32>
    %57 = arith.ori %55, %56 : vector<4x256xi32>
    %58 = tpu.bitcast %57 : vector<4x256xi32> -> vector<4x256xf32>
    %cst_19 = arith.constant 0.000000e+00 : f32
    %59 = vector.broadcast %cst_19 : f32 to vector<4x256xf32>
    %60 = arith.subf %59, %58 : vector<4x256xf32>
    %cst_20 = arith.constant 1.000000e+00 : f32
    %61 = vector.shape_cast %10 : vector<1x256xi1> to vector<1x256xi1>
    %62 = vector.broadcast %61 : vector<1x256xi1> to vector<4x256xi1>
    %63 = vector.broadcast %cst_20 : f32 to vector<4x256xf32>
    %64 = arith.select %62, %60, %63 : vector<4x256xi1>, vector<4x256xf32>
    %c0_21 = arith.constant 0 : index
    %c0_22 = arith.constant 0 : index
    %65 = vector.load %arg4[%c0_21, %c0_22] : memref<4x256xf32, #tpu.memory_space<vmem>>, vector<4x256xf32>
    tpu.vector_store %arg4[%c0_21, %c0_22], %64 {strides = array<i32>} : memref<4x256xf32, #tpu.memory_space<vmem>>, vector<4x256xf32>,
    return
  }
  func.func @transform_0(%arg0: i32, %arg1: i32) -> (i32, i32, i32) {
    %c0_i32 = arith.constant 0 : i32
    %c0_i32_0 = arith.constant 0 : i32
    return %arg0, %c0_i32, %arg1 : i32, i32, i32
  }
  func.func @transform_1(%arg0: i32, %arg1: i32) -> (i32, i32, i32) {
    %c0_i32 = arith.constant 0 : i32
    %c0_i32_0 = arith.constant 0 : i32
    return %arg0, %c0_i32, %arg1 : i32, i32, i32
  }
  func.func @transform_2(%arg0: i32, %arg1: i32) -> (i32, i32) {
    %c1_i32 = arith.constant 1 : i32
    %0 = arith.muli %arg0, %c1_i32 : i32
    %1 = arith.addi %0, %arg1 : i32
    %c0_i32 = arith.constant 0 : i32
    %c0_i32_0 = arith.constant 0 : i32
    return %c0_i32, %1 : i32, i32
  }
  func.func @transform_3(%arg0: i32, %arg1: i32) -> (i32, i32) {
    %c1_i32 = arith.constant 1 : i32
    %0 = arith.muli %arg0, %c1_i32 : i32
    %1 = arith.addi %0, %arg1 : i32
    %c0_i32 = arith.constant 0 : i32
    %c0_i32_0 = arith.constant 0 : i32
    return %c0_i32, %1 : i32, i32
  }
  func.func @transform_4(%arg0: i32, %arg1: i32) -> (i32, i32) {
    %c1_i32 = arith.constant 1 : i32
    %0 = arith.muli %arg0, %c1_i32 : i32
    %1 = arith.addi %0, %arg1 : i32
    %c0_i32 = arith.constant 0 : i32
    %c0_i32_0 = arith.constant 0 : i32
    return %c0_i32, %1 : i32, i32
  }
}

module attributes {stable_mosaic.version = 11 : i64} {
  func.func @_lovasz_kernel(%arg0: i32, %arg1: memref<256x256xbf16, #tpu.memory_space<vmem>>, %arg2: memref<4x512xf32, #tpu.memory_space<vmem>>, %arg3: memref<4x1xf32, #tpu.memory_space<vmem>>, %arg4: memref<1x1xf32, #tpu.memory_space<vmem>>, %arg5: memref<4x1xf32, #tpu.memory_space<vmem>>, %arg6: memref<4x1xf32, #tpu.memory_space<vmem>>) attributes {dimension_semantics = [#tpu.dimension_semantics<arbitrary>], iteration_bounds = array<i64: 1>, scalar_prefetch = 0 : i64, scratch_operands = 2 : i64, tpu.core_type = #tpu.core_type<tc>, window_params = [{pipeline_mode = #tpu.pipeline_mode<synchronous>, transform_indices = @transform_0, window_bounds = array<i64: 256, 256>}, {transform_indices = @transform_1, window_bounds = array<i64: 4, 512>}, {pipeline_mode = #tpu.pipeline_mode<synchronous>, transform_indices = @transform_2, window_bounds = array<i64: 4, 1>}, {pipeline_mode = #tpu.pipeline_mode<synchronous>, transform_indices = @transform_3, window_bounds = array<i64: 1, 1>}]} {
    %c0_i32 = arith.constant 0 : i32
    %0 = arith.cmpi eq, %arg0, %c0_i32 : i32
    %1 = arith.extui %0 : i1 to i32
    %c0_i32_0 = arith.constant 0 : i32
    %2 = arith.cmpi ne, %1, %c0_i32_0 : i32
    scf.if %2 {
      %cst_41 = arith.constant 0.000000e+00 : f32
      %121 = vector.broadcast %cst_41 : f32 to vector<4x1xf32>
      %c0_42 = arith.constant 0 : index
      %c0_43 = arith.constant 0 : index
      %122 = vector.load %arg5[%c0_42, %c0_43] : memref<4x1xf32, #tpu.memory_space<vmem>>, vector<4x1xf32>
      tpu.vector_store %arg5[%c0_42, %c0_43], %121 {strides = array<i32>} : memref<4x1xf32, #tpu.memory_space<vmem>>, vector<4x1xf32>,
      %cst_44 = arith.constant 0.000000e+00 : f32
      %123 = vector.broadcast %cst_44 : f32 to vector<4x1xf32>
      %c0_45 = arith.constant 0 : index
      %c0_46 = arith.constant 0 : index
      %124 = vector.load %arg6[%c0_45, %c0_46] : memref<4x1xf32, #tpu.memory_space<vmem>>, vector<4x1xf32>
      tpu.vector_store %arg6[%c0_45, %c0_46], %123 {strides = array<i32>} : memref<4x1xf32, #tpu.memory_space<vmem>>, vector<4x1xf32>,
    } else {
    }
    %c0 = arith.constant 0 : index
    %c0_1 = arith.constant 0 : index
    %3 = vector.load %arg3[%c0, %c0_1] : memref<4x1xf32, #tpu.memory_space<vmem>>, vector<4x1xf32>
    %c0_2 = arith.constant 0 : index
    %c0_3 = arith.constant 0 : index
    %4 = vector.load %arg1[%c0_2, %c0_3] : memref<256x256xbf16, #tpu.memory_space<vmem>>, vector<256x256xbf16>
    %5 = tpu.iota {dimensions = array<i32: 1>} : vector<4x256xi32>
    %c0_4 = arith.constant 0 : index
    %c0_5 = arith.constant 0 : index
    %6 = vector.load %arg5[%c0_4, %c0_5] : memref<4x1xf32, #tpu.memory_space<vmem>>, vector<4x1xf32>
    %cst = arith.constant 0.000000e+00 : f32
    %7 = vector.broadcast %cst : f32 to vector<4x1xf32>
    %c0_6 = arith.constant 0 : index
    %c0_7 = arith.constant 0 : index
    %8 = vector.load %arg2[%c0_6, %c0_7] : memref<4x512xf32, #tpu.memory_space<vmem>>, vector<4x256xf32>
    %9 = tpu.bitcast %8 : vector<4x256xf32> -> vector<4x256xi32>
    %c1_i32 = arith.constant 1 : i32
    %10 = vector.broadcast %c1_i32 : i32 to vector<4x256xi32>
    %11 = arith.andi %9, %10 : vector<4x256xi32>
    %12 = arith.sitofp %11 : vector<4x256xi32> to vector<4x256xf32>
    %c2147483646_i32 = arith.constant 2147483646 : i32
    %13 = vector.broadcast %c2147483646_i32 : i32 to vector<4x256xi32>
    %14 = arith.andi %9, %13 : vector<4x256xi32>
    %15 = tpu.bitcast %14 : vector<4x256xi32> -> vector<4x256xf32>
    %cst_8 = arith.constant 2.000000e+00 : f32
    %16 = vector.broadcast %cst_8 : f32 to vector<4x256xf32>
    %17 = arith.subf %15, %16 : vector<4x256xf32>
    %cst_9 = arith.constant 0.000000e+00 : f32
    %18 = vector.broadcast %cst_9 : f32 to vector<4x256xf32>
    %19 = arith.maximumf %17, %18 : vector<4x256xf32>
    %20 = arith.truncf %12 : vector<4x256xf32> to vector<4x256xbf16>
    %cst_10 = arith.constant dense<0.000000e+00> : vector<4x256xf32>
    %21 = tpu.matmul %20, %4, %cst_10 {dimension_numbers = #tpu.dot_dimension_numbers<[1], [0], [0], [1], [0, 0, 1, 1], [], []>} : vector<4x256xbf16>, vector<256x256xbf16>, vector<4x256xf32> -> vector<4x256xf32>
    %22 = vector.broadcast %6 : vector<4x1xf32> to vector<4x256xf32>
    %23 = arith.addf %22, %21 : vector<4x256xf32>
    %c512_i32 = arith.constant 512 : i32
    %24 = arith.muli %arg0, %c512_i32 : i32
    %c0_i32_11 = arith.constant 0 : i32
    %25 = arith.addi %24, %c0_i32_11 : i32
    %26 = vector.broadcast %25 : i32 to vector<4x256xi32>
    %27 = arith.addi %26, %5 : vector<4x256xi32>
    %c0_i32_12 = arith.constant 0 : i32
    %28 = vector.broadcast %c0_i32_12 : i32 to vector<4x256xi32>
    %29 = arith.cmpi eq, %27, %28 : vector<4x256xi32>
    %30 = arith.sitofp %27 : vector<4x256xi32> to vector<4x256xf32>
    %cst_13 = arith.constant 1.000000e+00 : f32
    %31 = vector.broadcast %cst_13 : f32 to vector<4x256xf32>
    %32 = arith.addf %30, %31 : vector<4x256xf32>
    %33 = vector.broadcast %3 : vector<4x1xf32> to vector<4x256xf32>
    %34 = arith.addf %33, %32 : vector<4x256xf32>
    %35 = arith.subf %34, %23 : vector<4x256xf32>
    %36 = vector.broadcast %3 : vector<4x1xf32> to vector<4x256xf32>
    %37 = arith.subf %36, %23 : vector<4x256xf32>
    %38 = arith.divf %37, %35 : vector<4x256xf32>
    %cst_14 = arith.constant 1.000000e+00 : f32
    %39 = vector.broadcast %cst_14 : f32 to vector<4x256xf32>
    %40 = arith.subf %39, %38 : vector<4x256xf32>
    %41 = arith.subf %23, %12 : vector<4x256xf32>
    %42 = vector.broadcast %3 : vector<4x1xf32> to vector<4x256xf32>
    %43 = arith.addf %42, %30 : vector<4x256xf32>
    %44 = arith.subf %43, %41 : vector<4x256xf32>
    %cst_15 = arith.constant 1.000000e+00 : f32
    %45 = vector.broadcast %cst_15 : f32 to vector<4x256xf32>
    %46 = arith.select %29, %45, %44 : vector<4x256xi1>, vector<4x256xf32>
    %47 = vector.broadcast %3 : vector<4x1xf32> to vector<4x256xf32>
    %48 = arith.subf %47, %41 : vector<4x256xf32>
    %49 = arith.divf %48, %46 : vector<4x256xf32>
    %cst_16 = arith.constant 1.000000e+00 : f32
    %50 = vector.broadcast %cst_16 : f32 to vector<4x256xf32>
    %51 = arith.subf %50, %49 : vector<4x256xf32>
    %52 = arith.subf %40, %51 : vector<4x256xf32>
    %53 = arith.select %29, %40, %52 : vector<4x256xi1>, vector<4x256xf32>
    %54 = arith.mulf %19, %53 : vector<4x256xf32>
    %cst_17 = arith.constant dense<0.000000e+00> : vector<4xf32>
    %55 = vector.multi_reduction <add>, %54, %cst_17 [1] : vector<4x256xf32> to vector<4xf32>
    %56 = vector.shape_cast %55 : vector<4xf32> to vector<4x1xf32>
    %57 = arith.addf %7, %56 : vector<4x1xf32>
    %cst_18 = arith.constant dense<0.000000e+00> : vector<4xf32>
    %58 = vector.multi_reduction <add>, %12, %cst_18 [1] : vector<4x256xf32> to vector<4xf32>
    %59 = vector.shape_cast %58 : vector<4xf32> to vector<4x1xf32>
    %60 = arith.addf %6, %59 : vector<4x1xf32>
    %c0_19 = arith.constant 0 : index
    %c256 = arith.constant 256 : index
    %61 = vector.load %arg2[%c0_19, %c256] : memref<4x512xf32, #tpu.memory_space<vmem>>, vector<4x256xf32>
    %62 = tpu.bitcast %61 : vector<4x256xf32> -> vector<4x256xi32>
    %c1_i32_20 = arith.constant 1 : i32
    %63 = vector.broadcast %c1_i32_20 : i32 to vector<4x256xi32>
    %64 = arith.andi %62, %63 : vector<4x256xi32>
    %65 = arith.sitofp %64 : vector<4x256xi32> to vector<4x256xf32>
    %c2147483646_i32_21 = arith.constant 2147483646 : i32
    %66 = vector.broadcast %c2147483646_i32_21 : i32 to vector<4x256xi32>
    %67 = arith.andi %62, %66 : vector<4x256xi32>
    %68 = tpu.bitcast %67 : vector<4x256xi32> -> vector<4x256xf32>
    %cst_22 = arith.constant 2.000000e+00 : f32
    %69 = vector.broadcast %cst_22 : f32 to vector<4x256xf32>
    %70 = arith.subf %68, %69 : vector<4x256xf32>
    %cst_23 = arith.constant 0.000000e+00 : f32
    %71 = vector.broadcast %cst_23 : f32 to vector<4x256xf32>
    %72 = arith.maximumf %70, %71 : vector<4x256xf32>
    %73 = arith.truncf %65 : vector<4x256xf32> to vector<4x256xbf16>
    %cst_24 = arith.constant dense<0.000000e+00> : vector<4x256xf32>
    %74 = tpu.matmul %73, %4, %cst_24 {dimension_numbers = #tpu.dot_dimension_numbers<[1], [0], [0], [1], [0, 0, 1, 1], [], []>} : vector<4x256xbf16>, vector<256x256xbf16>, vector<4x256xf32> -> vector<4x256xf32>
    %75 = vector.broadcast %60 : vector<4x1xf32> to vector<4x256xf32>
    %76 = arith.addf %75, %74 : vector<4x256xf32>
    %c512_i32_25 = arith.constant 512 : i32
    %77 = arith.muli %arg0, %c512_i32_25 : i32
    %c256_i32 = arith.constant 256 : i32
    %78 = arith.addi %77, %c256_i32 : i32
    %79 = vector.broadcast %78 : i32 to vector<4x256xi32>
    %80 = arith.addi %79, %5 : vector<4x256xi32>
    %c0_i32_26 = arith.constant 0 : i32
    %81 = vector.broadcast %c0_i32_26 : i32 to vector<4x256xi32>
    %82 = arith.cmpi eq, %80, %81 : vector<4x256xi32>
    %83 = arith.sitofp %80 : vector<4x256xi32> to vector<4x256xf32>
    %cst_27 = arith.constant 1.000000e+00 : f32
    %84 = vector.broadcast %cst_27 : f32 to vector<4x256xf32>
    %85 = arith.addf %83, %84 : vector<4x256xf32>
    %86 = vector.broadcast %3 : vector<4x1xf32> to vector<4x256xf32>
    %87 = arith.addf %86, %85 : vector<4x256xf32>
    %88 = arith.subf %87, %76 : vector<4x256xf32>
    %89 = vector.broadcast %3 : vector<4x1xf32> to vector<4x256xf32>
    %90 = arith.subf %89, %76 : vector<4x256xf32>
    %91 = arith.divf %90, %88 : vector<4x256xf32>
    %cst_28 = arith.constant 1.000000e+00 : f32
    %92 = vector.broadcast %cst_28 : f32 to vector<4x256xf32>
    %93 = arith.subf %92, %91 : vector<4x256xf32>
    %94 = arith.subf %76, %65 : vector<4x256xf32>
    %95 = vector.broadcast %3 : vector<4x1xf32> to vector<4x256xf32>
    %96 = arith.addf %95, %83 : vector<4x256xf32>
    %97 = arith.subf %96, %94 : vector<4x256xf32>
    %cst_29 = arith.constant 1.000000e+00 : f32
    %98 = vector.broadcast %cst_29 : f32 to vector<4x256xf32>
    %99 = arith.select %82, %98, %97 : vector<4x256xi1>, vector<4x256xf32>
    %100 = vector.broadcast %3 : vector<4x1xf32> to vector<4x256xf32>
    %101 = arith.subf %100, %94 : vector<4x256xf32>
    %102 = arith.divf %101, %99 : vector<4x256xf32>
    %cst_30 = arith.constant 1.000000e+00 : f32
    %103 = vector.broadcast %cst_30 : f32 to vector<4x256xf32>
    %104 = arith.subf %103, %102 : vector<4x256xf32>
    %105 = arith.subf %93, %104 : vector<4x256xf32>
    %106 = arith.select %82, %93, %105 : vector<4x256xi1>, vector<4x256xf32>
    %107 = arith.mulf %72, %106 : vector<4x256xf32>
    %cst_31 = arith.constant dense<0.000000e+00> : vector<4xf32>
    %108 = vector.multi_reduction <add>, %107, %cst_31 [1] : vector<4x256xf32> to vector<4xf32>
    %109 = vector.shape_cast %108 : vector<4xf32> to vector<4x1xf32>
    %110 = arith.addf %57, %109 : vector<4x1xf32>
    %cst_32 = arith.constant dense<0.000000e+00> : vector<4xf32>
    %111 = vector.multi_reduction <add>, %65, %cst_32 [1] : vector<4x256xf32> to vector<4xf32>
    %112 = vector.shape_cast %111 : vector<4xf32> to vector<4x1xf32>
    %113 = arith.addf %60, %112 : vector<4x1xf32>
    %c0_33 = arith.constant 0 : index
    %c0_34 = arith.constant 0 : index
    %114 = vector.load %arg6[%c0_33, %c0_34] : memref<4x1xf32, #tpu.memory_space<vmem>>, vector<4x1xf32>
    %115 = arith.addf %114, %110 : vector<4x1xf32>
    %c0_35 = arith.constant 0 : index
    %c0_36 = arith.constant 0 : index
    %116 = vector.load %arg6[%c0_35, %c0_36] : memref<4x1xf32, #tpu.memory_space<vmem>>, vector<4x1xf32>
    tpu.vector_store %arg6[%c0_35, %c0_36], %115 {strides = array<i32>} : memref<4x1xf32, #tpu.memory_space<vmem>>, vector<4x1xf32>,
    %c0_37 = arith.constant 0 : index
    %c0_38 = arith.constant 0 : index
    %117 = vector.load %arg5[%c0_37, %c0_38] : memref<4x1xf32, #tpu.memory_space<vmem>>, vector<4x1xf32>
    tpu.vector_store %arg5[%c0_37, %c0_38], %113 {strides = array<i32>} : memref<4x1xf32, #tpu.memory_space<vmem>>, vector<4x1xf32>,
    %c0_i32_39 = arith.constant 0 : i32
    %118 = arith.cmpi eq, %arg0, %c0_i32_39 : i32
    %119 = arith.extui %118 : i1 to i32
    %c0_i32_40 = arith.constant 0 : i32
    %120 = arith.cmpi ne, %119, %c0_i32_40 : i32
    scf.if %120 {
      %cst_41 = arith.constant 0.000000e+00 : f32
      %121 = vector.broadcast %cst_41 : f32 to vector<4x1xf32>
      %122 = arith.cmpf ogt, %3, %121 : vector<4x1xf32>
      %123 = arith.extui %122 : vector<4x1xi1> to vector<4x1xi32>
      %124 = arith.sitofp %123 : vector<4x1xi32> to vector<4x1xf32>
      %125 = vector.shape_cast %124 : vector<4x1xf32> to vector<1x4x1xf32>
      %cst_42 = arith.constant dense<0.000000e+00> : vector<1xf32>
      %126 = vector.multi_reduction <add>, %125, %cst_42 [1, 2] : vector<1x4x1xf32> to vector<1xf32>
      %127 = vector.shape_cast %126 : vector<1xf32> to vector<1x1x1xf32>
      %128 = vector.extract %127[0, 0, 0] : f32 from vector<1x1x1xf32>
      %c0_43 = arith.constant 0 : index
      %c0_44 = arith.constant 0 : index
      %129 = vector.load %arg6[%c0_43, %c0_44] : memref<4x1xf32, #tpu.memory_space<vmem>>, vector<4x1xf32>
      %130 = arith.mulf %129, %124 : vector<4x1xf32>
      %131 = vector.shape_cast %130 : vector<4x1xf32> to vector<1x4x1xf32>
      %cst_45 = arith.constant dense<0.000000e+00> : vector<1xf32>
      %132 = vector.multi_reduction <add>, %131, %cst_45 [1, 2] : vector<1x4x1xf32> to vector<1xf32>
      %133 = vector.shape_cast %132 : vector<1xf32> to vector<1x1x1xf32>
      %134 = vector.extract %133[0, 0, 0] : f32 from vector<1x1x1xf32>
      %cst_46 = arith.constant 0.000000e+00 : f32
      %135 = arith.cmpf ogt, %128, %cst_46 : f32
      %cst_47 = arith.constant 1.000000e+00 : f32
      %136 = arith.maximumf %128, %cst_47 : f32
      %137 = arith.divf %134, %136 : f32
      %cst_48 = arith.constant 0.000000e+00 : f32
      %138 = arith.select %135, %137, %cst_48 : f32
      %139 = vector.broadcast %138 : f32 to vector<1x1xf32>
      %c0_49 = arith.constant 0 : index
      %c0_50 = arith.constant 0 : index
      %140 = vector.load %arg4[%c0_49, %c0_50] : memref<1x1xf32, #tpu.memory_space<vmem>>, vector<1x1xf32>
      tpu.vector_store %arg4[%c0_49, %c0_50], %139 {strides = array<i32>} : memref<1x1xf32, #tpu.memory_space<vmem>>, vector<1x1xf32>,
    } else {
    }
    return
  }
  func.func @transform_0(%arg0: i32) -> (i32, i32) {
    %c0_i32 = arith.constant 0 : i32
    %c0_i32_0 = arith.constant 0 : i32
    %c0_i32_1 = arith.constant 0 : i32
    return %c0_i32, %c0_i32_0 : i32, i32
  }
  func.func @transform_1(%arg0: i32) -> (i32, i32) {
    %c0_i32 = arith.constant 0 : i32
    %c0_i32_0 = arith.constant 0 : i32
    return %c0_i32, %arg0 : i32, i32
  }
  func.func @transform_2(%arg0: i32) -> (i32, i32) {
    %c0_i32 = arith.constant 0 : i32
    %c0_i32_0 = arith.constant 0 : i32
    %c0_i32_1 = arith.constant 0 : i32
    return %c0_i32, %c0_i32_0 : i32, i32
  }
  func.func @transform_3(%arg0: i32) -> (i32, i32) {
    %c0_i32 = arith.constant 0 : i32
    %c0_i32_0 = arith.constant 0 : i32
    %c0_i32_1 = arith.constant 0 : i32
    return %c0_i32, %c0_i32_0 : i32, i32
  }
}

</mosaic_0001>

<bundles_post_ra>
// kernel: simple_loss.2
= control target key start
LH: loop header
LB: loop body
LE: loop exit
PB: predicated region body
PF: predicated region fallthrough
CT: control target
= control target key end

     0   :  { %s712_s15 = smov 0   ;;  %s714_s16 = smov 0   ;;  %s813_s0 = inlined_call_operand.vmem [shape: f32[2,4,256], index: 0, kind: input, shape index: {}]   ;;  %s814_s1 = inlined_call_operand.vmem [shape: s32[2,1,256], index: 1, kind: input, shape index: {}]   ;;  %s815_s2 = inlined_call_operand.vmem [shape: f32[4,512], index: 2, kind: output, shape index: {0}]   ;;  %s816_s3 = inlined_call_operand.vmem [shape: f32[1,256], index: 3, kind: output, shape index: {1}]   ;;  %s817_s4 = inlined_call_operand.vmem [shape: f32[4,256], index: 4, kind: output, shape index: {2}]  }
   0x1   :  { %s716_s17 = smov 0  }
   0x2 LB: > { %s27_s18 = sadd.s32 1, %s679_s16  ;;  %p610_p0 = scmp.ge.s32.totalorder %s683_s17, 1  ;;  %s683_s17 = sphi %s716_s17, %s15_s17   ;;  %s679_s16 = sphi %s714_s16, %s819_s16   ;;  %s675_s15 = sphi %s712_s15, %s818_s15  }
   0x3   : > { %p29_p1 = scmp.ge.s32.totalorder %s27_s18, 2  ;;  %p208_p2 = scmp.lt.s32.totalorder %s683_s17, 3 }
   0x5   : > { %s821_s18 = smov (%p29_p1, %s27_s18), 0  ;;  %p209_p3 = pnand %p610_p0, %p208_p2 }
   0x6   : > { %p257_p4 = scmp.lt.s32.totalorder (!%p209_p3), %s675_s15, 1  ;;  %vm316_vm0 = vcmask (!%p209_p3), 1043456   ;;  %v296_v11 = vlaneseq (!%p209_p3)  ;;  %v685_v55 = vmov (!%p209_p3), 0   ;;  %v686_v63 = vmov (!%p209_p3), 0.0   ;;  %s614_s28 = sshll.u32 (!%p209_p3), %s675_s15, 1 }
   0x7   : > { %212 = sbr.rel (%p209_p3) target bundleno = 292 (0x124), region = 28  ;;  %vm380_vm6 = vcmask (!%p209_p3), 1040384   ;;  %p277_p5 = scmp.lt.s32.totalorder (!%p209_p3), %s614_s28, 3 }
   0x8   : > { %v743_v16 = vshrl.u32 (!%p209_p3), %v296_v11, 7 }
   0xa   : > { %v300_v19 = vsub.s32 (!%p209_p3), 0, %v743_v16  ;;  %v304_v22 = vsub.s32 (!%p209_p3), 1, %v743_v16 }
   0xe   : > { %s734_s19 = scalar_select %p257_p4, %s675_s15, 1 }
   0xf   : > { %s823_s28 = smov (!%p277_p5, %s614_s28), 3 }
  0x10   : > { %s621_s20 = sshll.u32 %s734_s19, 3  ;;  %s613_s24 = sshll.u32 %s734_s19, 1 }
  0x11   : > { %s264_s23 = scalar_lea.vmem %s813_s0, %s621_s20  ;;  %s273_s27 = scalar_lea.vmem %s814_s1, %s613_s24 }
  0x12   : > { %v294_v0 = vld [vmem:[%s264_s23] sm:$0xff]  ;;  %s615_s29 = sshll.u32 %s823_s28, 2  ;;  %s616_s7 = sshll.u32 %s734_s19, 2 }
  0x13   : > { %v314_v1 = vcombine.high %v294_v0, %v294_v0  ;;  %v317_v2 = vsel %vm316_vm0, %v294_v0, -inf  ;;  %v295_v21 = vld [vmem:[%s273_s27] sm:$0x3]  ;;  %s280_s6 = scalar_lea.vmem %s815_s2, %s615_s29  ;;  %s292_s10 = scalar_lea.vmem %s817_s4, %s616_s7 }
  0x14   : > { %v318_v3 = vrot.slane %v317_v2, 4  ;;  %v750_v24 = vrot.slane %v295_v21, %v300_v19  ;;  %v752_v25 = vrot.slane %v295_v21, %v304_v22  ;;  %vm312_vm3 = vcmp.ne.s32.totalorder %v295_v21, 0  ;;  %s286_s14 = scalar_lea.vmem %s816_s3, %s734_s19 }
  0x15   : > { %v324_v4 = vsel %vm316_vm0, %v314_v1, -inf  ;;  %v396_v56 = vsel %vm312_vm3, 1, %v685_v55 }
  0x16   : > { %v319_v5 = vmax.f32 %v317_v2, %v318_v3  ;;  %v325_v6 = vrot.slane %v324_v4, 4  ;;  %vm306_vm1 = vcmp.eq.s32.totalorder %v743_v16, %v750_v24  ;;  %vm307_vm2 = vcmp.eq.s32.totalorder %v743_v16, %v752_v25 }
  0x17   : > { %v400_v59 = vrot.slane %v396_v56, %v300_v19  ;;  %v404_v60 = vrot.slane %v396_v56, %v304_v22  ;;  %v618_v1 = vsel %vm307_vm2, 1.0, %v686_v63 }
  0x18   : > { %v320_v7 = vrot.slane %v319_v5, 2  ;;  %v326_v8 = vmax.f32 %v324_v4, %v325_v6 }
  0x19   : > { %vm405_vm4 = vcmp.eq.s32.totalorder %v400_v59, 1  ;;  %vm406_vm5 = vcmp.eq.s32.totalorder %v404_v60, 1 }
  0x1a   : > { %v321_v9 = vmax.f32 %v319_v5, %v320_v7  ;;  %v327_v10 = vrot.slane %v326_v8, 2  ;;  %v408_v11 = vsel %vm406_vm5, %v618_v1, 0.0 }
  0x1b   : > { %v410_v21 = vsel %vm316_vm0, %v408_v11, 0.0 }
  0x1c   : > { %v322_v12 = vrot.slane %v321_v9, 1  ;;  %v328_v13 = vmax.f32 %v326_v8, %v327_v10 }
  0x1e   : > { %v323_v14 = vmax.f32 %v321_v9, %v322_v12  ;;  %v329_v15 = vrot.slane %v328_v13, 1 }
  0x20   : > { %v330_v17 = vmax.f32 %v328_v13, %v329_v15 }
  0x22   : > { %v333_v18 = vcombine.low %v323_v14, %v330_v17 }
  0x24   : > { %v335_v20 = vsub.f32 %v294_v0, %v333_v18  ;;  %v617_v0 = vsel %vm306_vm1, 1.0, %v686_v63 }
  0x25   : > { %v407_v10 = vsel %vm405_vm4, %v617_v0, 0.0 }
  0x26   : > { %v336_v23 = vmul.f32 1.442695, %v335_v20  ;;  %v360_v26 = vcombine.high %v335_v20, %v335_v20  ;;  %v362_v27 = vsel %vm306_vm1, %v335_v20, 0.0  ;;  %v409_v20 = vsel %vm316_vm0, %v407_v10, 0.0 }
  0x27   : > { %v364_v30 = vsel %vm316_vm0, %v362_v27, 0.0 }
  0x28   : > { %651 = vpow2.f32 %v336_v23  ;;  %v363_v28 = vsel %vm307_vm2, %v360_v26, 0.0  ;;  %v365_v36 = vrot.slane %v364_v30, 4  ;;  %v411_v26 = vadd.f32 %v410_v21, %v409_v20 }
  0x29   : > { %v371_v34 = vsel %vm316_vm0, %v363_v28, 0.0 }
  0x2a   : > { %v372_v39 = vrot.slane %v371_v34, 4  ;;  %v366_v42 = vadd.f32 %v365_v36, %v364_v30  ;;  %v308_v36 = vsel %vm306_vm1, 1, %v685_v55 }
  0x2c   : > { %v373_v45 = vadd.f32 %v372_v39, %v371_v34  ;;  %v367_v48 = vrot.slane %v366_v42, 2 }
  0x2e   : > { %v374_v51 = vrot.slane %v373_v45, 2  ;;  %v368_v53 = vadd.f32 %v367_v48, %v366_v42 }
  0x30   : > { %v375_v54 = vadd.f32 %v374_v51, %v373_v45  ;;  %v369_v57 = vrot.slane %v368_v53, 1 }
  0x32   : > { %v764_v29 = vpop.eup %651  ;;  %v376_v58 = vrot.slane %v375_v54, 1  ;;  %v370_v61 = vadd.f32 %v369_v57, %v368_v53 }
  0x33   : > { %v339_v31 = vcombine.high %v764_v29, %v764_v29  ;;  %v341_v32 = vsel %vm316_vm0, %v764_v29, 0.0 }
  0x34   : > { %v342_v33 = vrot.slane %v341_v32, 4  ;;  %v377_v4 = vadd.f32 %v376_v58, %v375_v54 }
  0x35   : > { %v348_v35 = vsel %vm316_vm0, %v339_v31, 0.0 }
  0x36   : > { %v343_v37 = vadd.f32 %v342_v33, %v341_v32  ;;  %v349_v38 = vrot.slane %v348_v35, 4 }
  0x38   : > { %v344_v40 = vrot.slane %v343_v37, 2  ;;  %v350_v41 = vadd.f32 %v349_v38, %v348_v35 }
  0x3a   : > { %v345_v43 = vadd.f32 %v344_v40, %v343_v37  ;;  %v351_v44 = vrot.slane %v350_v41, 2 }
  0x3c   : > { %v346_v46 = vrot.slane %v345_v43, 1  ;;  %v352_v47 = vadd.f32 %v351_v44, %v350_v41 }
  0x3e   : > { %v347_v49 = vadd.f32 %v346_v46, %v345_v43  ;;  %v353_v50 = vrot.slane %v352_v47, 1 }
  0x40   : > { %v354_v52 = vadd.f32 %v353_v50, %v352_v47  ;;  %653 = vlog2.f32 %v347_v49 }
  0x41   : > { %655 = vrcp.f32 %v347_v49 }
  0x42   : > { %657 = vlog2.f32 %v354_v52 }
  0x43   : > { %659 = vrcp.f32 %v354_v52 }
  0x4a   : > { %v654_v62 = vpop.eup %653 }
  0x4b   : > { %v656_v2 = vpop.eup %655  ;;  %v356_v3 = vmul.f32 0.6931472, %v654_v62 }
  0x4c   : > { %v658_v5 = vpop.eup %657  ;;  %v418_v6 = vmul.f32 %v656_v2, %v347_v49 }
  0x4d   : > { %v660_v7 = vpop.eup %659  ;;  %v358_v8 = vmul.f32 0.6931472, %v658_v5  ;;  %v378_v9 = vsub.f32 %v356_v3, %v370_v61 }
  0x4e   : > { %v419_v12 = vmul.f32 %v660_v7, %v354_v52  ;;  %v420_v13 = vsub.f32 2.0, %v418_v6 }
  0x4f   : > { %v379_v14 = vsub.f32 %v358_v8, %v377_v4  ;;  %v381_v15 = vsel %vm380_vm6, %v378_v9, 0.0 }
  0x50   : > { %v421_v17 = vsub.f32 2.0, %v419_v12  ;;  %v422_v18 = vmul.f32 %v656_v2, %v420_v13 }
  0x51   : > { %v382_v19 = vsel %vm380_vm6, %v379_v14, 0.0 }
  0x52   : > { %v383_v22 = vadd.f32 %v382_v19, %v381_v15  ;;  %v423_v23 = vmul.f32 %v660_v7, %v421_v17 }
  0x54   : > { %384 = vadd.xlane.f32.xlu0 %v383_v22  ;;  %v426_v27 = vcombine.low %v422_v18, %v423_v23 }
  0x56   : > { %v428_v28 = vmul.f32 %v764_v29, %v426_v27  ;;  %v309_v29 = vsel %vm307_vm2, 1, %v685_v55 }
  0x58   : > { %v430_v30 = vcombine.high %v428_v28, %v428_v28  ;;  %v432_v31 = vsub.f32 %v617_v0, %v428_v28  ;;  %412 = vadd.xlane.f32.xlu0 %v411_v26 }
  0x5a   : > { %v433_v32 = vsub.f32 %v618_v1, %v430_v30  ;;  %v434_v33 = vand.u32 2147483647, %v432_v31 }
  0x5c   : > { %v435_v34 = vand.u32 2147483647, %v433_v32  ;;  %v436_v35 = vadd.f32 2.0, %v434_v33 }
  0x5e   : > { %v437_v37 = vadd.f32 2.0, %v435_v34  ;;  %v440_v38 = vand.u32 4294967294, %v436_v35 }
  0x60   : > { %v441_v39 = vand.u32 4294967294, %v437_v37  ;;  %v442_v40 = vor.u32 %v440_v38, %v308_v36 }
  0x62   : > { %v443_v41 = vor.u32 %v441_v39, %v309_v29  ;;  %v446_v42 = vsub.f32 0.0, %v442_v40 }
  0x64   : > { %v447_v43 = vsub.f32 0.0, %v443_v41  ;;  %v448_v44 = vsel %vm405_vm4, %v446_v42, 1.0 }
  0x66   : > { %v449_v24 = vsel %vm406_vm5, %v447_v43, 1.0 }
  0x67   : > { %v452_v45 = vcombine.low %v448_v44, %v449_v24 }
  0x69   : > { %454 = vst [vmem:[%s280_s6] sm:$0xff] %v452_v45 }
  0xe1   : > { %v385_v46 = vpop.xlane.xlu0 %384 }
  0xe2   : > { %v386_v16 = vrot.slane %v385_v46, 4 }
  0xe4   : > { %v387_v25 = vadd.f32 %v386_v16, %v385_v46 }
  0xe5   : > { %v413_v47 = vpop.xlane.xlu0 %412 }
  0xe6   : > { %v388_v48 = vrot.slane %v387_v25, 2  ;;  %v414_v49 = vmul.f32 0.0078125, %v413_v47 }
  0xe8   : > { %v389_v50 = vadd.f32 %v388_v48, %v387_v25  ;;  %415 = vst [vmem:[%s292_s10] sm:$0xf] %v414_v49 }
  0xea   : > { %v390_v51 = vrot.slane %v389_v50, 1 }
  0xec   : > { %v391_v52 = vadd.f32 %v390_v51, %v389_v50 }
  0xee   : > { %622 = vpush %v391_v52 }
 0x11f   : > { %s623_s11 = spop %622 }
 0x120   : > { %s393_s15 = smul.f32 0.0078125, %s623_s11 }
 0x122   : > { %v394_v53 = vstv %s393_s15 }
 0x123   : > { %395 = vst [vmem:[%s286_s14] sm:$0x1] %v394_v53 }
 0x124 PF: > { %s15_s17 = sadd.s32 1, %s683_s17   ;;  %s818_s15 = smov %s679_s16 }
 0x125   : > { %p12_p6 = scmp.ge.s32.totalorder %s15_s17, 4   ;;  %s819_s16 = smov %s821_s18 }
 0x127   :  { %14 = sbr.rel (!%p12_p6) target bundleno = 2 (0x2), region = 85 }

// kernel: simple_loss.3
= control target key start
LH: loop header
LB: loop body
LE: loop exit
PB: predicated region body
PF: predicated region fallthrough
CT: control target
= control target key end

     0   :  { %v665_v2 = vmov 0   ;;  %vm333_vm0 = vcmask 1043456   ;;  %vm19_vm1 = vcmask 3072   ;;  %v666_v22 = vmov 0.0   ;;  %s907_s0 = inlined_call_operand.vmem [shape: bf16[256,256], index: 0, kind: input, shape index: {}]   ;;  %s908_s1 = inlined_call_operand.vmem [shape: f32[4,512], index: 1, kind: input, shape index: {}]   ;;  %s909_s2 = inlined_call_operand.vmem [shape: f32[4,1], index: 2, kind: input, shape index: {}]   ;;  %s910_s3 = inlined_call_operand.hbm [shape: f32[1,1], index: 3, kind: output, shape index: {}]  }
   0x1   :  { %v573_v0 = vld [vmem:[%s907_s0 + $0x4] ss:$8 sps:$4 sm:$0xff]   ;;  %v575_v1 = vld [vmem:[%s907_s0] ss:$8 sps:$4 sm:$0xff]   ;;  %572 = vset.pattern.permute.xlu1 %v665_v2  ;;  %571 = vset.pattern.permute.xlu0 %v665_v2  ;;  %v576_v3 = vld [vmem:[%s907_s0 + $0x14] ss:$8 sps:$4 sm:$0xff]  }
   0x2   :  { %236 = vmatprep.subr.bf16.mxu0 %v573_v0  ;;  %363 = vmatprep.subr.bf16.mxu1 %v573_v0  ;;  %v701_v4 = vld [vmem:[%s908_s1] sm:$0xff]  ;;  %v578_v5 = vld [vmem:[%s907_s0 + $0x10] ss:$8 sps:$4 sm:$0xff]   ;;  %v583_v14 = vld [vmem:[%s907_s0 + $0x34] ss:$8 sps:$4 sm:$0xff]  }
   0x3   :  { %237 = vmatpush1.bf16.msra.mxu0 %v575_v1  ;;  %364 = vmatpush1.bf16.msra.mxu1 %v575_v1  ;;  %v708_v6 = vcombine.high %v701_v4, %v701_v4  ;;  %v62_v7 = vand.u32 1, %v701_v4  ;;  %v580_v8 = vld [vmem:[%s907_s0 + $0x24] ss:$8 sps:$4 sm:$0xff]   ;;  %v582_v13 = vld [vmem:[%s907_s0 + $0x20] ss:$8 sps:$4 sm:$0xff]  }
   0x4   :  { %238 = vmatprep.subr.bf16.mxu0 %v576_v3  ;;  %365 = vmatprep.subr.bf16.mxu1 %v576_v3  ;;  %v585_v18 = vld [vmem:[%s907_s0 + $0x30] ss:$8 sps:$4 sm:$0xff]   ;;  %v586_v19 = vld [vmem:[%s907_s0 + $0x44] ss:$8 sps:$4 sm:$0xff]   ;;  %v588_v20 = vld [vmem:[%s907_s0 + $0x40] ss:$8 sps:$4 sm:$0xff]  }
   0x5   :  { %v63_v9 = vand.u32 1, %v708_v6  ;;  %v715_v10 = vcvt.s32.f32 %v62_v7  ;;  %v589_v21 = vld [vmem:[%s907_s0 + $0x54] ss:$8 sps:$4 sm:$0xff]   ;;  %20 = vst.msk [vmem:[#allocation2] sm:$0xf] %vm19_vm1, %v666_v22  ;;  %v756_v25 = vld [vmem:[%s908_s1 + $0x8] sm:$0xff] }
   0x6   :  { %21 = vst.msk [vmem:[#allocation3] sm:$0xf] %vm19_vm1, %v666_v22  ;;  %v591_v23 = vld [vmem:[%s907_s0 + $0x50] ss:$8 sps:$4 sm:$0xff]   ;;  %v592_v24 = vld [vmem:[%s907_s0 + $0x64] ss:$8 sps:$4 sm:$0xff]   ;;  %v760_v26 = vcombine.high %v756_v25, %v756_v25 }
   0x7   :  { %239 = vmatpush1.bf16.msra.mxu0 %v578_v5  ;;  %v717_v11 = vcvt.s32.f32 %v63_v9  ;;  %v340_v12 = vsel %vm333_vm0, %v715_v10, 0.0  ;;  %366 = vmatpush1.bf16.msra.mxu1 %v578_v5  ;;  %v765_v27 = vld [vmem:[%s909_s2] sm:$0xf] }
   0x8   :  { %240 = vmatprep.subr.bf16.mxu0 %v580_v8  ;;  %367 = vmatprep.subr.bf16.mxu1 %v580_v8 }
   0x9   :  { %v341_v15 = vsel %vm333_vm0, %v717_v11, 0.0  ;;  %v75_v16 = vpack.c.bf16 %v717_v11, %v717_v11 }
   0xa   :  { %v342_v17 = vadd.f32 %v341_v15, %v340_v12 }
   0xb   :  { %241 = vmatpush1.bf16.msra.mxu0 %v582_v13  ;;  %368 = vmatpush1.bf16.msra.mxu1 %v582_v13 }
   0xc   :  { %343 = vadd.xlane.f32.xlu0 %v342_v17  ;;  %242 = vmatprep.subr.bf16.mxu0 %v583_v14 }
   0xd   :  { %369 = vmatprep.subr.bf16.mxu1 %v583_v14  ;;  %268 = vmatprep.mubr.bf16.mxu0 %v75_v16 }
   0xf   :  { %243 = vmatpush1.bf16.msra.mxu0 %v585_v18  ;;  %370 = vmatpush1.bf16.msra.mxu1 %v585_v18 }
  0x10   :  { %244 = vmatprep.subr.bf16.mxu0 %v586_v19  ;;  %371 = vmatprep.subr.bf16.mxu1 %v586_v19 }
  0x13   :  { %245 = vmatpush1.bf16.msra.mxu0 %v588_v20  ;;  %372 = vmatpush1.bf16.msra.mxu1 %v588_v20 }
  0x14   :  { %246 = vmatprep.subr.bf16.mxu0 %v589_v21  ;;  %373 = vmatprep.subr.bf16.mxu1 %v589_v21 }
  0x15   :  { %8 = vsyncpa [#allocation5], 0  ;;  %v594_v28 = vld [vmem:[%s907_s0 + $0x60] ss:$8 sps:$4 sm:$0xff]   ;;  %v595_v29 = vld [vmem:[%s907_s0 + $0x74] ss:$8 sps:$4 sm:$0xff]   ;;  %296 = vperm.xlu1 %572, %v765_v27   ;;  %v74_v53 = vpack.c.bf16 %v715_v10, %v715_v10  ;;  %v55_v59 = vlaneseq }
  0x16   :  { %v350_v30 = vand.u32 1, %v760_v26  ;;  %v597_v32 = vld [vmem:[%s907_s0 + $0x70] ss:$8 sps:$4 sm:$0xff]   ;;  %v598_v33 = vld [vmem:[%s907_s0 + $0x84] ss:$8 sps:$4 sm:$0xff]   ;;  %v349_v48 = vand.u32 1, %v756_v25 }
  0x17   :  { %247 = vmatpush1.bf16.msra.mxu0 %v591_v23  ;;  %374 = vmatpush1.bf16.msra.mxu1 %v591_v23  ;;  %v600_v35 = vld [vmem:[%s907_s0 + $0x80] ss:$8 sps:$4 sm:$0xff]   ;;  %v601_v37 = vld [vmem:[%s907_s0 + $0x94] ss:$8 sps:$4 sm:$0xff]   ;;  %v603_v38 = vld [vmem:[%s907_s0 + $0x90] ss:$8 sps:$4 sm:$0xff]  }
  0x18   :  { %248 = vmatprep.subr.bf16.mxu0 %v592_v24  ;;  %375 = vmatprep.subr.bf16.mxu1 %v592_v24  ;;  %v775_v31 = vcvt.s32.f32 %v350_v30  ;;  %v58_v36 = vld [vmem:[#allocation2] sm:$0xf]  ;;  %v604_v39 = vld [vmem:[%s907_s0 + $0xa4] ss:$8 sps:$4 sm:$0xff]   ;;  %v607_v41 = vld [vmem:[%s907_s0 + $0xb4] ss:$8 sps:$4 sm:$0xff]   ;;  %v828_v51 = vcvt.s32.f32 %v349_v48 }
  0x19   :  { %v606_v40 = vld [vmem:[%s907_s0 + $0xa0] ss:$8 sps:$4 sm:$0xff]   ;;  %v609_v42 = vld [vmem:[%s907_s0 + $0xb0] ss:$8 sps:$4 sm:$0xff]   ;;  %v610_v43 = vld [vmem:[%s907_s0 + $0xc4] ss:$8 sps:$4 sm:$0xff]  }
  0x1a   :  { %v362_v34 = vpack.c.bf16 %v775_v31, %v775_v31  ;;  %v612_v44 = vld [vmem:[%s907_s0 + $0xc0] ss:$8 sps:$4 sm:$0xff]   ;;  %v613_v45 = vld [vmem:[%s907_s0 + $0xd4] ss:$8 sps:$4 sm:$0xff]   ;;  %v615_v46 = vld [vmem:[%s907_s0 + $0xd0] ss:$8 sps:$4 sm:$0xff]   ;;  %v361_v54 = vpack.c.bf16 %v828_v51, %v828_v51 }
  0x1b   :  { %249 = vmatpush1.bf16.msra.mxu0 %v594_v28  ;;  %376 = vmatpush1.bf16.msra.mxu1 %v594_v28  ;;  %v616_v47 = vld [vmem:[%s907_s0 + $0xe4] ss:$8 sps:$4 sm:$0xff]   ;;  %v618_v49 = vld [vmem:[%s907_s0 + $0xe0] ss:$8 sps:$4 sm:$0xff]   ;;  %v619_v50 = vld [vmem:[%s907_s0 + $0xf4] ss:$8 sps:$4 sm:$0xff]  }
  0x1c   :  { %250 = vmatprep.subr.bf16.mxu0 %v595_v29  ;;  %377 = vmatprep.subr.bf16.mxu1 %v595_v29  ;;  %v621_v52 = vld [vmem:[%s907_s0 + $0xf0] ss:$8 sps:$4 sm:$0xff]   ;;  %vm475_vm2 = vcmp.gt.f32.partialorder %v765_v27, 0.0  ;;  %v846_v60 = vand.u32 127, %v55_v59  ;;  %s667_s24 = smov 1.0   ;;  %s668_s29 = smov [#allocation4]  }
  0x1d   :  { %395 = vmatprep.mubr.bf16.mxu1 %v362_v34  ;;  %v842_v57 = vsel %vm475_vm2, 1.0, %v666_v22  ;;  %s516_s30 = sshll.u32 %s668_s29, 4  ;;  %vm508_vm4 = vcmask 0   ;;  %s517_s30 = int_to_ptr.vmem [resolvable:$true] %s516_s30 }
  0x1e   :  { %v478_v58 = vsel %vm19_vm1, %v842_v57, 0.0  ;;  %v57_v61 = vadd.s32 128, %v846_v60  ;;  %v290_v62 = vcvt.s32.f32 %v846_v60  ;;  %v413_v0 = vadd.s32 256, %v846_v60  ;;  %s641_s4 = scalar_lea.vmem %s517_s30, 16  ;;  %s645_s5 = scalar_lea.vmem %s517_s30, 32 }
  0x1f   :  { %251 = vmatpush1.bf16.msra.mxu0 %v597_v32  ;;  %378 = vmatpush1.bf16.msra.mxu1 %v597_v32  ;;  %vm288_vm3 = vcmp.eq.s32.totalorder %v846_v60, 0  ;;  %p642_p1 = scmp.ne.s32.totalorder %s517_s30, %s641_s4  ;;  %p646_p2 = scmp.lt.s32.totalorder %s517_s30, %s517_s30 }
  0x20   :  { %252 = vmatprep.subr.bf16.mxu0 %v598_v33  ;;  %379 = vmatprep.subr.bf16.mxu1 %v598_v33  ;;  %v291_v63 = vcvt.s32.f32 %v57_v61  ;;  %v292_v1 = vadd.f32 1.0, %v290_v62  ;;  %v414_v2 = vadd.s32 256, %v57_v61  ;;  %v417_v8 = vcvt.s32.f32 %v413_v0  ;;  %p647_p3 = scmp.lt.s32.totalorder %s645_s5, %s641_s4 }
  0x21   :  { %v354_v0 = vand.u32 2147483646, %v760_v26 }
  0x22   :  { %279 = vperm.xlu0 %571, %v58_v36   ;;  %v293_v5 = vadd.f32 1.0, %v291_v63  ;;  %v418_v12 = vcvt.s32.f32 %v414_v2  ;;  %v419_v23 = vadd.f32 1.0, %v417_v8  ;;  %p648_p4 = por %p647_p3, %p646_p2 }
  0x23   :  { %253 = vmatpush1.bf16.msra.mxu0 %v600_v35  ;;  %380 = vmatpush1.bf16.msra.mxu1 %v600_v35  ;;  %v559_v26 = vadd.f32 -2.0, %v354_v0 }
  0x24   :  { %254 = vmatprep.subr.bf16.mxu0 %v601_v37  ;;  %381 = vmatprep.subr.bf16.mxu1 %v601_v37  ;;  %v420_v30 = vadd.f32 1.0, %v418_v12  ;;  %p649_p5 = pnand %p648_p4, %p642_p1 }
  0x27   :  { %255 = vmatpush1.bf16.msra.mxu0 %v603_v38  ;;  %382 = vmatpush1.bf16.msra.mxu1 %v603_v38 }
  0x28   :  { %256 = vmatprep.subr.bf16.mxu0 %v604_v39  ;;  %383 = vmatprep.subr.bf16.mxu1 %v604_v39 }
  0x2b   :  { %257 = vmatpush1.bf16.msra.mxu0 %v606_v40  ;;  %384 = vmatpush1.bf16.msra.mxu1 %v606_v40 }
  0x2c   :  { %258 = vmatprep.subr.bf16.mxu0 %v607_v41  ;;  %385 = vmatprep.subr.bf16.mxu1 %v607_v41 }
  0x2f   :  { %259 = vmatpush1.bf16.msra.mxu0 %v609_v42  ;;  %386 = vmatpush1.bf16.msra.mxu1 %v609_v42 }
  0x30   :  { %260 = vmatprep.subr.bf16.mxu0 %v610_v43  ;;  %387 = vmatprep.subr.bf16.mxu1 %v610_v43 }
  0x33   :  { %261 = vmatpush1.bf16.msra.mxu0 %v612_v44  ;;  %388 = vmatpush1.bf16.msra.mxu1 %v612_v44 }
  0x34   :  { %262 = vmatprep.subr.bf16.mxu0 %v613_v45  ;;  %389 = vmatprep.subr.bf16.mxu1 %v613_v45 }
  0x37   :  { %263 = vmatpush1.bf16.msra.mxu0 %v615_v46  ;;  %390 = vmatpush1.bf16.msra.mxu1 %v615_v46 }
  0x38   :  { %264 = vmatprep.subr.bf16.mxu0 %v616_v47  ;;  %391 = vmatprep.subr.bf16.mxu1 %v616_v47 }
  0x3b   :  { %265 = vmatpush1.bf16.msra.mxu0 %v618_v49  ;;  %392 = vmatpush1.bf16.msra.mxu1 %v618_v49  ;;  %v67_v49 = vand.u32 2147483646, %v708_v6 }
  0x3c   :  { %266 = vmatprep.subr.bf16.mxu0 %v619_v50  ;;  %393 = vmatprep.subr.bf16.mxu1 %v619_v50 }
  0x3f   :  { %267 = vmatpush1.bf16.msra.mxu0 %v621_v52  ;;  %394 = vmatpush1.bf16.msra.mxu1 %v621_v52 }
  0x41   :  { %479 = vadd.xlane.f32.xlu0 %v478_v58 }
  0x42   :  { %269 = vmatmul.mubr.bf16.vlgmr.msra.gmra.mrb[0].mxu0 %v74_v53  ;;  %396 = vmatmul.mubr.bf16.vlgmr.msra.gmra.mrb[0].mxu1 %v361_v54  ;;  %v66_v54 = vand.u32 2147483646, %v701_v4 }
  0x94   :  { %v851_v3 = vpop.permute.xlu1 %296 }
  0x95   :  { %v299_v9 = vadd.f32 %v851_v3, %v292_v1  ;;  %v300_v14 = vadd.f32 %v851_v3, %v293_v5  ;;  %v313_v16 = vadd.f32 %v851_v3, %v290_v62  ;;  %v314_v21 = vadd.f32 %v851_v3, %v291_v63 }
  0x96   :  { %v421_v37 = vadd.f32 %v419_v23, %v851_v3  ;;  %v422_v39 = vadd.f32 %v420_v30, %v851_v3  ;;  %v435_v42 = vadd.f32 %v417_v8, %v851_v3  ;;  %v436_v44 = vadd.f32 %v418_v12, %v851_v3 }
  0x97   :  { %v353_v63 = vand.u32 2147483646, %v756_v25 }
  0x99   :  { %v344_v55 = vpop.xlane.xlu0 %343 }
  0x9a   :  { %v837_v56 = vadd.f32 %v344_v55, %v58_v36  ;;  %v525_v55 = vadd.f32 -2.0, %v67_v49 }
  0x9c   :  { %406 = vperm.xlu1 %572, %v837_v56   ;;  %v73_v8 = vmax.f32 %v525_v55, 0.0 }
  0xa1   :  { %v280_v7 = vpop.permute.xlu0 %279 }
 0x115   :  { %v270_v13 = vpop.f32.mrb[0].mxu0  ;;  %v397_v15 = vpop.f32.mrb[0].mxu1 }
 0x116   :  { %v282_v17 = vadd.f32 %v280_v7, %v270_v13  ;;  %v272_v18 = vpop.f32.mrb[1].mxu0  ;;  %v399_v19 = vpop.f32.mrb[1].mxu1 }
 0x117   :  { %v283_v20 = vadd.f32 %v280_v7, %v272_v18  ;;  %v274_v22 = vpop.f32.mrb[2].mxu0  ;;  %v401_v24 = vpop.f32.mrb[2].mxu1  ;;  %v524_v7 = vadd.f32 -2.0, %v66_v54 }
 0x118   :  { %v301_v27 = vsub.f32 %v299_v9, %v282_v17  ;;  %v311_v28 = vsub.f32 %v282_v17, %v715_v10  ;;  %v275_v29 = vpop.f32.mrb[3].mxu0  ;;  %v402_v32 = vpop.f32.mrb[3].mxu1  ;;  %v303_v58 = vsub.f32 %v851_v3, %v282_v17  ;;  %v558_v17 = vadd.f32 -2.0, %v353_v63 }
 0x119   :  { %v302_v33 = vsub.f32 %v300_v14, %v283_v20  ;;  %v312_v34 = vsub.f32 %v283_v20, %v717_v11  ;;  %v304_v52 = vsub.f32 %v851_v3, %v283_v20 }
 0x11a   :  { %623 = vrcp.f32 %v301_v27  ;;  %v315_v35 = vsub.f32 %v313_v16, %v311_v28  ;;  %v319_v1 = vsub.f32 %v851_v3, %v311_v28  ;;  %v72_v27 = vmax.f32 %v524_v7, 0.0 }
 0x11b   :  { %625 = vrcp.f32 %v302_v33  ;;  %v316_v36 = vsub.f32 %v314_v21, %v312_v34  ;;  %v407_v38 = vpop.permute.xlu1 %406  ;;  %v320_v61 = vsub.f32 %v851_v3, %v312_v34  ;;  %v359_v33 = vmax.f32 %v558_v17, 0.0 }
 0x11c   :  { %v409_v40 = vadd.f32 %v407_v38, %v397_v15  ;;  %v410_v41 = vadd.f32 %v407_v38, %v399_v19  ;;  %v317_v10 = vsel %vm288_vm3, 1.0, %v315_v35 }
 0x11d   :  { %627 = vrcp.f32 %v316_v36  ;;  %v360_v36 = vmax.f32 %v559_v26, 0.0 }
 0x11e   :  { %v423_v11 = vsub.f32 %v421_v37, %v409_v40  ;;  %v424_v43 = vsub.f32 %v422_v39, %v410_v41  ;;  %v433_v45 = vsub.f32 %v409_v40, %v828_v51  ;;  %v434_v46 = vsub.f32 %v410_v41, %v775_v31 }
 0x11f   :  { %629 = vrcp.f32 %v317_v10  ;;  %v425_v12 = vsub.f32 %v851_v3, %v409_v40  ;;  %v426_v16 = vsub.f32 %v851_v3, %v410_v41 }
 0x120   :  { %631 = vrcp.f32 %v423_v11  ;;  %v437_v47 = vsub.f32 %v435_v42, %v433_v45  ;;  %v438_v48 = vsub.f32 %v436_v44, %v434_v46  ;;  %v441_v25 = vsub.f32 %v851_v3, %v433_v45 }
 0x121   :  { %633 = vrcp.f32 %v424_v43  ;;  %v442_v24 = vsub.f32 %v851_v3, %v434_v46 }
 0x122   :  { %635 = vrcp.f32 %v437_v47 }
 0x123   :  { %637 = vrcp.f32 %v438_v48  ;;  %v480_v48 = vpop.xlane.xlu0 %479 }
 0x124   :  { %v624_v50 = vpop.eup %623  ;;  %v481_v49 = vrot.slane %v480_v48, 4 }
 0x125   :  { %v626_v53 = vpop.eup %625  ;;  %v306_v6 = vmul.f32 %v624_v50, %v303_v58 }
 0x126   :  { %v308_v59 = vmul.f32 %v626_v53, %v304_v52  ;;  %v482_v50 = vadd.f32 %v481_v49, %v480_v48 }
 0x127   :  { %v628_v62 = vpop.eup %627  ;;  %v309_v18 = vsub.f32 1.0, %v306_v6 }
 0x128   :  { %v324_v2 = vmul.f32 %v628_v62, %v320_v61  ;;  %v310_v4 = vsub.f32 1.0, %v308_v59  ;;  %v483_v52 = vrot.slane %v482_v50, 2  ;;  %v467_v59 = vld [vmem:[#allocation3] sm:$0xf] }
 0x129   :  { %v630_v5 = vpop.eup %629 }
 0x12a   :  { %v632_v9 = vpop.eup %631  ;;  %v322_v13 = vmul.f32 %v630_v5, %v319_v1  ;;  %v326_v14 = vsub.f32 1.0, %v324_v2  ;;  %v484_v53 = vadd.f32 %v483_v52, %v482_v50  ;;  %v461_v1 = vsel %vm333_vm0, %v828_v51, 0.0 }
 0x12b   :  { %v634_v15 = vpop.eup %633  ;;  %v428_v19 = vmul.f32 %v632_v9, %v425_v12  ;;  %v462_v2 = vsel %vm333_vm0, %v775_v31, 0.0 }
 0x12c   :  { %v325_v20 = vsub.f32 1.0, %v322_v13  ;;  %v328_v21 = vsub.f32 %v310_v4, %v326_v14  ;;  %v636_v22 = vpop.eup %635  ;;  %v430_v23 = vmul.f32 %v634_v15, %v426_v16  ;;  %v485_v54 = vrot.slane %v484_v53, 1 }
 0x12d   :  { %v638_v28 = vpop.eup %637  ;;  %v444_v32 = vmul.f32 %v636_v22, %v441_v25  ;;  %v431_v37 = vsub.f32 1.0, %v428_v19  ;;  %v463_v7 = vadd.f32 %v462_v2, %v461_v1 }
 0x12e   :  { %v327_v29 = vsub.f32 %v309_v18, %v325_v20  ;;  %v332_v30 = vmul.f32 %v328_v21, %v73_v8  ;;  %v446_v34 = vmul.f32 %v638_v28, %v442_v24  ;;  %v432_v41 = vsub.f32 1.0, %v430_v23 }
 0x12f   :  { %v447_v38 = vsub.f32 1.0, %v444_v32  ;;  %v486_v55 = vadd.f32 %v485_v54, %v484_v53 }
 0x130   :  { %v329_v35 = vsel %vm288_vm3, %v309_v18, %v327_v29  ;;  %v335_v40 = vsel %vm333_vm0, %v332_v30, 0.0  ;;  %v448_v10 = vsub.f32 1.0, %v446_v34 }
 0x131   :  { %v331_v39 = vmul.f32 %v329_v35, %v72_v27  ;;  %v449_v42 = vsub.f32 %v431_v37, %v447_v38  ;;  %561 = vpush %v486_v55 }
 0x132   :  { %v450_v11 = vsub.f32 %v432_v41, %v448_v10 }
 0x133   :  { %v334_v3 = vsel %vm333_vm0, %v331_v39, 0.0  ;;  %v453_v44 = vmul.f32 %v449_v42, %v359_v33 }
 0x134   :  { %v336_v43 = vadd.f32 %v335_v40, %v334_v3  ;;  %v454_v45 = vmul.f32 %v450_v11, %v360_v36 }
 0x135   :  { %v455_v46 = vsel %vm333_vm0, %v453_v44, 0.0 }
 0x136   :  { %337 = vadd.xlane.f32.xlu1 %v336_v43  ;;  %v456_v60 = vsel %vm333_vm0, %v454_v45, 0.0 }
 0x137   :  { %v457_v47 = vadd.f32 %v456_v60, %v455_v46 }
 0x13a   :  { %458 = vadd.xlane.f32.xlu1 %v457_v47 }
 0x162   :  { %s562_s0 = spop %561 }
 0x163   :  { %s501_s25 = smax.f32 %s667_s24, %s562_s0  ;;  %p500_p0 = scmp.gt.f32.partialorder %s562_s0, 0.0 }
 0x164   :  { %v502_v8 = vstv %s501_s25 }
 0x165   :  { %639 = vrcp.f32 %v502_v8 }
 0x16f   :  { %v640_v16 = vpop.eup %639 }
 0x1c3   :  { %v338_v58 = vpop.xlane.xlu1 %337 }
 0x1c7   :  { %v459_v61 = vpop.xlane.xlu1 %458 }
 0x1c8   :  { %v460_v62 = vadd.f32 %v459_v61, %v338_v58 }
 0x1ca   :  { %v468_v63 = vadd.f32 %v467_v59, %v460_v62 }
 0x1cc   :  { %470 = vst.msk [vmem:[#allocation3] sm:$0xf] %vm19_vm1, %v468_v63 }
 0x1d3   :  { %v488_v0 = vld [vmem:[#allocation3] sm:$0xf] }
 0x1d4   :  { %v489_v6 = vmul.f32 %v842_v57, %v488_v0 }
 0x1d6   :  { %v490_v5 = vsel %vm19_vm1, %v489_v6, 0.0 }
 0x1d7   :  { %491 = vadd.xlane.f32.xlu1 %v490_v5 }
 0x1db   :  { %464 = vadd.xlane.f32.xlu1 %v463_v7 }
 0x264   :  { %v492_v9 = vpop.xlane.xlu1 %491 }
 0x265   :  { %v493_v4 = vrot.slane %v492_v9, 4 }
 0x267   :  { %v494_v12 = vadd.f32 %v493_v4, %v492_v9 }
 0x268   :  { %v465_v57 = vpop.xlane.xlu1 %464 }
 0x269   :  { %v495_v13 = vrot.slane %v494_v12, 2  ;;  %v466_v51 = vadd.f32 %v465_v57, %v837_v56 }
 0x26b   :  { %471 = vst.msk [vmem:[#allocation2] sm:$0xf] %vm19_vm1, %v466_v51  ;;  %v496_v31 = vadd.f32 %v495_v13, %v494_v12 }
 0x26d   :  { %v497_v14 = vrot.slane %v496_v31, 1 }
 0x26f   :  { %v498_v15 = vadd.f32 %v497_v14, %v496_v31 }
 0x271   :  { %563 = vpush %v498_v15 }
 0x272   :  { %565 = vpush %v640_v16 }
 0x2a2   :  { %s564_s26 = spop %563 }
 0x2a3   :  { %s566_s27 = spop %565 }
 0x2a4   :  { %s505_s28 = smul.f32 %s566_s27, %s564_s26 }
 0x2a6   :  { %s912_s28 = smov (!%p500_p0, %s505_s28), 0.0 }
 0x2a7   :  { %v507_v25 = vstv %s912_s28 }
 0x2a8   :  { %509 = vst.msk [vmem:[#allocation4] sm:$0x1] %vm508_vm4, %v507_v25 }
 0x2a9   :  { %652 = shalt.err (!%p649_p5)
}
 0x2aa   :  { %s653_s8 = scalar_lea.hbm %s910_s3, 16 }
 0x2ab   :  { %p654_p6 = scmp.ne.s32.totalorder %s910_s3, %s653_s8  ;;  %p657_p7 = scmp.lt.u32.totalorder %s653_s8, %s910_s3 }
 0x2ad   :  { %p659_p8 = pnand %p657_p7, %p654_p6 }
 0x2af   :  { %662 = shalt.err (!%p659_p8)
}
 0x2b0   :  { %519 = dma.vmem_to_hbm [thread:$0]  %s517_s30, 16, %s910_s3, [#allocation5]  }
 0x2b1   :  { %663 = dma.done.wait [#allocation5], 16  }
 0x2b2   :  { %664 = vsyncadd [#allocation5], 4294967280 }
 0x2b3   :  { %523 = vsyncpa [#allocation5], 1 }

</bundles_post_ra>
